<compile_context>
chip_gen: v7x
topology: tpu7x:2x2x1
jax: 0.10.0
libtpu: 0.0.40
codegen_flags: <defaults>
</compile_context>

<pallas_src>
import jax
import jax.numpy as jnp
from jax.experimental import pallas as pl
from jax.experimental.pallas import tpu as pltpu


def _locked_dropout_kernel(x_ref, mask_ref, o_ref):
    # Broadcast multiply on the VPU; mask is f32, cast back to x.dtype here.
    o_ref[...] = (x_ref[...] * mask_ref[...]).astype(o_ref.dtype)


def _round_up(x, m):
    return -(-x // m) * m


def _native_sublanes(dtype):
    # dtype-native sublane count: 8 for 32-bit, 16 for 16-bit, 32 for 8-bit.
    return max(8, 32 // jnp.dtype(dtype).itemsize)


def _choose_seq_tile(S, row_bytes, sub, target_bytes, min_block_bytes=1 << 20):
    """Rows per tile when tiling only along S (full-BH strips)."""
    s_pad = _round_up(S, sub)
    rows = min(s_pad, max(sub, (target_bytes // row_bytes) // sub * sub))
    # v7x has 2 TensorCores sharing HBM: prefer an even number of grid blocks
    # so both get work, as long as each block stays >= ~1 MiB.
    n = pl.cdiv(S, rows)
    if n % 2 == 1 and S * row_bytes >= 2 * min_block_bytes:
        rows_alt = max(sub, _round_up(pl.cdiv(S, n + 1), sub))
        if pl.cdiv(S, rows_alt) % 2 == 0 and rows_alt * row_bytes >= min_block_bytes:
            rows = rows_alt
    return rows


def locked_dropout(x, key, dropout=0.5, training=True, *,
                   target_tile_bytes=8 << 20):
    """JAX/Pallas equivalent of LockedDropout.forward(x, dropout).

    NOTE: `training` and `dropout` must be static (non-traced) under jit; the
    passthrough branches below are taken at trace time, mirroring the
    Python-level `if not self.training or not dropout` in the PyTorch module.
    """
    if not training or dropout == 0.0:
        return x

    keep_prob = 1.0 - dropout
    S, B, H = x.shape
    BH = B * H
    x2 = x.reshape(S, BH)

    # Locked mask: sampled once per (batch, hidden) position, reused for every
    # sequence step.  Kept in f32 so the 1/keep_prob scale is not rounded to
    # x.dtype before the multiply (kernel casts the product back to x.dtype).
    mask = (jax.random.bernoulli(key, p=keep_prob, shape=(1, BH))
            .astype(jnp.float32) * jnp.float32(1.0 / keep_prob))

    itemsize = jnp.dtype(x.dtype).itemsize
    sub = _native_sublanes(x.dtype)
    row_bytes = BH * itemsize

    if row_bytes <= target_tile_bytes:
        # Preferred: full-BH strips, 1-D grid over S.  Mask block index is
        # constant -> DMA'd once for the whole kernel.
        ts = _choose_seq_tile(S, row_bytes, sub, target_tile_bytes)
        grid = (pl.cdiv(S, ts),)
        in_specs = [
            pl.BlockSpec((ts, BH), lambda i: (i, 0)),
            pl.BlockSpec((1, BH), lambda i: (0, 0)),
        ]
        out_specs = pl.BlockSpec((ts, BH), lambda i: (i, 0))
        dim_sem = ("parallel",)
    else:
        # Fallback for very wide BH: lane-tile, with the seq axis innermost so
        # the mask (pinned along seq) is only re-fetched once per lane tile.
        t_bh = max(128, (target_tile_bytes // (sub * itemsize)) // 128 * 128)
        t_bh = min(t_bh, _round_up(BH, 128))
        ts = max(sub, (target_tile_bytes // (t_bh * itemsize)) // sub * sub)
        ts = min(ts, _round_up(S, sub))
        grid = (pl.cdiv(BH, t_bh), pl.cdiv(S, ts))
        in_specs = [
            pl.BlockSpec((ts, t_bh), lambda j, i: (i, j)),
            pl.BlockSpec((1, t_bh), lambda j, i: (0, j)),
        ]
        out_specs = pl.BlockSpec((ts, t_bh), lambda j, i: (i, j))
        dim_sem = ("parallel", "parallel")

    cost = pl.CostEstimate(
        flops=S * BH,
        transcendentals=0,
        bytes_accessed=2 * S * BH * itemsize + BH * 4,
    )

    out2 = pl.pallas_call(
        _locked_dropout_kernel,
        out_shape=jax.ShapeDtypeStruct((S, BH), x.dtype),
        grid=grid,
        in_specs=in_specs,
        out_specs=out_specs,
        compiler_params=pltpu.CompilerParams(
            dimension_semantics=dim_sem,
            # Double-buffered footprint with 8 MiB tiles is ~32 MiB + mask;
            # 48 MiB limit leaves headroom and fits v7x's 64 MiB VMEM as well
            # as v5e/v6e's 128 MiB.
            vmem_limit_bytes=48 * 1024 * 1024,
        ),
        cost_estimate=cost,
    )(x2, mask)

    return out2.reshape(S, B, H)


if __name__ == "__main__":
    key = jax.random.PRNGKey(0)
    kx, kmask = jax.random.split(key)

    S, B, H = 8, 2, 32
    x = jax.random.normal(kx, (S, B, H), dtype=jnp.float32)

    dropout = 0.5
    out = jax.block_until_ready(
        locked_dropout(x, kmask, dropout=dropout, training=True))

    # Shape/dtype preserved.
    assert out.shape == x.shape and out.dtype == x.dtype

    # Every element is either 0 or x / (1 - dropout).
    scaled = x / (1.0 - dropout)
    is_zero = jnp.abs(out) < 1e-6
    is_scaled = jnp.abs(out - scaled) < 1e-5
    assert bool(jnp.all(is_zero | is_scaled))

    # The effective mask is identical across the sequence axis (locked).
    valid = jnp.abs(x) > 1e-6
    ratio = jnp.where(valid, out / jnp.where(valid, x, 1.0), 0.0)
    same = jnp.where(valid & valid[0:1],
                     jnp.abs(ratio - ratio[0:1]) < 1e-4, True)
    assert bool(jnp.all(same))

    # Eval mode / dropout=0 passthrough.
    out_eval = jax.block_until_ready(
        locked_dropout(x, kmask, dropout=dropout, training=False))
    assert bool(jnp.all(out_eval == x))
    out_p0 = jax.block_until_ready(
        locked_dropout(x, kmask, dropout=0.0, training=True))
    assert bool(jnp.all(out_p0 == x))

    print("KERNEL_OK")
</pallas_src>

<mosaic_0001>
module attributes {stable_mosaic.version = 11 : i64} {
  func.func @_locked_dropout_kernel(%arg0: i32, %arg1: memref<8x64xf32, #tpu.memory_space<vmem>>, %arg2: memref<1x64xf32, #tpu.memory_space<vmem>>, %arg3: memref<8x64xf32, #tpu.memory_space<vmem>>) attributes {dimension_semantics = [#tpu.dimension_semantics<parallel>], iteration_bounds = array<i64: 1>, scalar_prefetch = 0 : i64, scratch_operands = 0 : i64, tpu.core_type = #tpu.core_type<tc>, window_params = [{transform_indices = @transform_0, window_bounds = array<i64: 8, 64>}, {pipeline_mode = #tpu.pipeline_mode<synchronous>, transform_indices = @transform_1, window_bounds = array<i64: 1, 64>}, {transform_indices = @transform_2, window_bounds = array<i64: 8, 64>}]} {
    %c0 = arith.constant 0 : index
    %c0_0 = arith.constant 0 : index
    %0 = vector.load %arg1[%c0, %c0_0] : memref<8x64xf32, #tpu.memory_space<vmem>>, vector<8x64xf32>
    %c0_1 = arith.constant 0 : index
    %c0_2 = arith.constant 0 : index
    %1 = vector.load %arg2[%c0_1, %c0_2] : memref<1x64xf32, #tpu.memory_space<vmem>>, vector<1x64xf32>
    %2 = vector.broadcast %1 : vector<1x64xf32> to vector<8x64xf32>
    %3 = arith.mulf %0, %2 : vector<8x64xf32>
    %c0_3 = arith.constant 0 : index
    %c0_4 = arith.constant 0 : index
    %4 = vector.load %arg3[%c0_3, %c0_4] : memref<8x64xf32, #tpu.memory_space<vmem>>, vector<8x64xf32>
    tpu.vector_store %arg3[%c0_3, %c0_4], %3 {strides = array<i32>} : memref<8x64xf32, #tpu.memory_space<vmem>>, vector<8x64xf32>,
    return
  }
  func.func @transform_0(%arg0: i32) -> (i32, i32) {
    %c0_i32 = arith.constant 0 : i32
    %c0_i32_0 = arith.constant 0 : i32
    return %arg0, %c0_i32 : i32, i32
  }
  func.func @transform_1(%arg0: i32) -> (i32, i32) {
    %c0_i32 = arith.constant 0 : i32
    %c0_i32_0 = arith.constant 0 : i32
    %c0_i32_1 = arith.constant 0 : i32
    return %c0_i32, %c0_i32_0 : i32, i32
  }
  func.func @transform_2(%arg0: i32) -> (i32, i32) {
    %c0_i32 = arith.constant 0 : i32
    %c0_i32_0 = arith.constant 0 : i32
    return %arg0, %c0_i32 : i32, i32
  }
}

</mosaic_0001>

<bundles_post_ra>
// kernel: tpu_custom_call.1
= control target key start
LH: loop header
LB: loop body
LE: loop exit
PB: predicated region body
PF: predicated region fallthrough
CT: control target
= control target key end

     0   :  { %7 = vsyncpa [#allocation3], 0  ;;  %s145_s0 = inlined_call_operand.hbm [shape: f32[8,64], index: 0, kind: input, shape index: {}]   ;;  %s146_s1 = inlined_call_operand.vmem [shape: f32[1,64], index: 1, kind: input, shape index: {}]   ;;  %s147_s2 = inlined_call_operand.hbm [shape: f32[8,64], index: 2, kind: output, shape index: {}]  }
   0x1   :  { %8 = vsyncpa [#allocation4], 0  ;;  %s101_s9 = smov [#allocation2]   ;;  %s53_s13 = scalar_lea.hbm %s145_s0, 128 }
   0x2   :  { %s15_s10 = sshll.u32 %s101_s9, 4  ;;  %p54_p0 = scmp.ne.s32.totalorder %s145_s0, %s53_s13  ;;  %s16_s10 = int_to_ptr.vmem [resolvable:$true] %s15_s10 }
   0x3   :  { %p57_p1 = scmp.lt.u32.totalorder %s53_s13, %s145_s0 }
   0x5   :  { %p59_p2 = pnand %p57_p1, %p54_p0 }
   0x7   :  { %62 = shalt.err (!%p59_p2)
}
   0x8   :  { %s63_s18 = scalar_lea.vmem %s16_s10, 128  ;;  %p68_p4 = scmp.lt.s32.totalorder %s16_s10, %s16_s10 }
   0x9   :  { %p64_p3 = scmp.ne.s32.totalorder %s16_s10, %s63_s18  ;;  %p69_p5 = scmp.lt.s32.totalorder %s63_s18, %s63_s18 }
   0xb   :  { %p70_p6 = por %p69_p5, %p68_p4 }
   0xd   :  { %p71_p7 = pnand %p70_p6, %p64_p3 }
   0xf   :  { %74 = shalt.err (!%p71_p7)
}
  0x10   :  { %18 = dma.hbm_to_vmem [thread:$0]  %s145_s0, 128, %s16_s10, [#allocation3]  }
  0x11   :  { %97 = dma.done.wait [#allocation3], 128  }
  0x12   :  { %98 = vsyncadd [#allocation3], 4294967168  ;;  %s102_s21 = smov [#allocation5]   ;;  %v24_v0 = vld [vmem:[#allocation2] sm:$0xff]  ;;  %vm33_vm0 = vcmask 523264  }
  0x13   :  { %s41_s22 = sshll.u32 %s102_s21, 4  ;;  %v50_v1 = vld [vmem:[%s146_s1] ss:$0 sm:$0xff]  ;;  %s42_s22 = int_to_ptr.vmem [resolvable:$true] %s41_s22 }
  0x14   :  { %v32_v2 = vmul.f32 %v50_v1, %v24_v0  ;;  %s75_s25 = scalar_lea.vmem %s42_s22, 128  ;;  %p80_p9 = scmp.lt.s32.totalorder %s42_s22, %s42_s22 }
  0x15   :  { %p76_p8 = scmp.ne.s32.totalorder %s42_s22, %s75_s25  ;;  %p81_p10 = scmp.lt.s32.totalorder %s75_s25, %s75_s25 }
  0x16   :  { %34 = vst.msk [vmem:[#allocation5] sm:$0xff] %vm33_vm0, %v32_v2 }
  0x17   :  { %p82_p11 = por %p81_p10, %p80_p9 }
  0x19   :  { %p83_p12 = pnand %p82_p11, %p76_p8 }
  0x1b   :  { %86 = shalt.err (!%p83_p12)
}
  0x1c   :  { %s87_s27 = scalar_lea.hbm %s147_s2, 128 }
  0x1d   :  { %p88_p13 = scmp.ne.s32.totalorder %s147_s2, %s87_s27  ;;  %p91_p0 = scmp.lt.u32.totalorder %s87_s27, %s147_s2 }
  0x1f   :  { %p93_p1 = pnand %p91_p0, %p88_p13 }
  0x21   :  { %96 = shalt.err (!%p93_p1)
}
  0x22   :  { %44 = dma.vmem_to_hbm [thread:$0]  %s42_s22, 128, %s147_s2, [#allocation4]  }
  0x23   :  { %99 = dma.done.wait [#allocation4], 128  }
  0x24   :  { %100 = vsyncadd [#allocation4], 4294967168 }
  0x25   :  { %48 = vsyncpa [#allocation3], 1 }
  0x26   :  { %49 = vsyncpa [#allocation4], 1 }

</bundles_post_ra>
